<compile_context>
chip_gen: v7x
topology: tpu7x:2x2x1
jax: 0.10.0
libtpu: 0.0.40
codegen_flags: <defaults>
</compile_context>

<pallas_src>
import jax
import jax.numpy as jnp
from jax.experimental import pallas as pl
from jax.experimental.pallas import tpu as pltpu

STATE_DIM = 16   # state_dim
HIDDEN = 32      # hidden_size
LAYERS = 3       # gru_layer_num
BATCH = 8
LN_EPS = 1e-5


def elmo_kernel(x_ref, h_ref, emb_w_ref, emb_b_ref,
                w_ih_ref, w_hh_ref, b_i_ref, b_hn_ref,
                ln_w_ref, ln_b_ref, scale_ref, out_ref):
    H = HIDDEN

    # embedding: (B, S) @ (S, H) + (1, H)
    x = jnp.dot(x_ref[...], emb_w_ref[...],
                preferred_element_type=jnp.float32) + emb_b_ref[...]

    # scale[i] = gamma * s[i]  (SMEM scalars -> scalar slot)
    ret = scale_ref[0] * x

    for i in range(LAYERS):              # static unroll over layers
        h = h_ref[i]                     # (B, H)

        # Fused gate matmuls: one (B,H)x(H,3H) per side, gate order (r, z, n).
        # b_i already contains b_ih + b_hh for the r/z gates and b_ih_n for n.
        gates_i = jnp.dot(x, w_ih_ref[i],
                          preferred_element_type=jnp.float32) + b_i_ref[i]
        gates_h = jnp.dot(h, w_hh_ref[i],
                          preferred_element_type=jnp.float32)

        r = jax.nn.sigmoid(gates_i[:, 0:H] + gates_h[:, 0:H])
        z = jax.nn.sigmoid(gates_i[:, H:2 * H] + gates_h[:, H:2 * H])
        n = jnp.tanh(gates_i[:, 2 * H:3 * H]
                     + r * (gates_h[:, 2 * H:3 * H] + b_hn_ref[i]))
        cur_h = (1.0 - z) * n + z * h    # (B, H)

        # LayerNorm over last dim (eps = 1e-5), affine
        mu = jnp.mean(cur_h, axis=-1, keepdims=True)
        var = jnp.mean((cur_h - mu) ** 2, axis=-1, keepdims=True)
        normed = (cur_h - mu) * jax.lax.rsqrt(var + LN_EPS)
        normed = normed * ln_w_ref[i] + ln_b_ref[i]

        # dropout is identity in eval mode
        x = x + normed
        ret = ret + scale_ref[i + 1] * cur_h

    out_ref[...] = ret                   # gamma already folded into scale


def pack_params(p):
    """Pack raw per-gate params into the lane-dense fused-matmul layout."""
    w_ih, w_hh = p["w_ih"], p["w_hh"]          # (L, 3, Hin, H)
    b_ih, b_hh = p["b_ih"], p["b_hh"]          # (L, 3, 1, H)

    # (L, 3, Hin, H) -> (L, Hin, 3H), gate-major along the lane axis
    w_ih_cat = jnp.concatenate([w_ih[:, 0], w_ih[:, 1], w_ih[:, 2]], axis=-1)
    w_hh_cat = jnp.concatenate([w_hh[:, 0], w_hh[:, 1], w_hh[:, 2]], axis=-1)

    # r/z biases folded (b_ih + b_hh); n keeps only b_ih_n here.
    b_i_cat = jnp.concatenate([b_ih[:, 0] + b_hh[:, 0],
                               b_ih[:, 1] + b_hh[:, 1],
                               b_ih[:, 2]], axis=-1)        # (L, 1, 3H)
    b_hn = b_hh[:, 2]                                       # (L, 1, H)

    # gamma folded into s -> one SMEM scalar vector
    scale = (p["gamma"][0, 0] * p["s"][0]).reshape(LAYERS + 1)

    return dict(emb_w=p["emb_w"], emb_b=p["emb_b"],
                w_ih_cat=w_ih_cat, w_hh_cat=w_hh_cat,
                b_i_cat=b_i_cat, b_hn=b_hn,
                ln_w=p["ln_w"], ln_b=p["ln_b"], scale=scale)


def elmo_forward(x, hiddens, params):
    pk = pack_params(params)
    vm = pl.BlockSpec(memory_space=pltpu.MemorySpace.VMEM)
    sm = pl.BlockSpec(memory_space=pltpu.MemorySpace.SMEM)

    args = (x, hiddens,
            pk["emb_w"], pk["emb_b"],
            pk["w_ih_cat"], pk["w_hh_cat"], pk["b_i_cat"], pk["b_hn"],
            pk["ln_w"], pk["ln_b"], pk["scale"])
    in_specs = [vm] * (len(args) - 1) + [sm]   # everything VMEM except scale

    return pl.pallas_call(
        elmo_kernel,
        out_shape=jax.ShapeDtypeStruct((x.shape[0], HIDDEN), jnp.float32),
        in_specs=in_specs,
        out_specs=vm,
    )(*args)


def init_params(key):
    ks = jax.random.split(key, 10)
    b_emb = 1.0 / (STATE_DIM ** 0.5)   # nn.Linear default init bound
    b_gru = 1.0 / (HIDDEN ** 0.5)      # nn.GRUCell default init bound

    def u(k, shape, b):
        return jax.random.uniform(k, shape, jnp.float32, -b, b)

    return dict(
        emb_w=u(ks[0], (STATE_DIM, HIDDEN), b_emb),          # Linear weight, transposed
        emb_b=u(ks[1], (1, HIDDEN), b_emb),
        w_ih=u(ks[2], (LAYERS, 3, HIDDEN, HIDDEN), b_gru),    # (r,z,n), transposed
        w_hh=u(ks[3], (LAYERS, 3, HIDDEN, HIDDEN), b_gru),
        b_ih=u(ks[4], (LAYERS, 3, 1, HIDDEN), b_gru),
        b_hh=u(ks[5], (LAYERS, 3, 1, HIDDEN), b_gru),
        ln_w=jnp.ones((LAYERS, 1, HIDDEN), jnp.float32),      # LayerNorm affine
        ln_b=jnp.zeros((LAYERS, 1, HIDDEN), jnp.float32),
        s=u(ks[6], (1, LAYERS + 1), 1.0),                     # self.s
        gamma=u(ks[7], (1, 1), 1.0),                          # self.gamma
    )


def elmo_reference(x, hiddens, p):
    # pure-JAX reference (uses the RAW, un-packed params) for correctness check
    xe = x @ p["emb_w"] + p["emb_b"]
    ret = p["s"][0, 0] * xe
    cur_x = xe
    for i in range(LAYERS):
        h = hiddens[i]
        ir = cur_x @ p["w_ih"][i, 0] + p["b_ih"][i, 0]
        iz = cur_x @ p["w_ih"][i, 1] + p["b_ih"][i, 1]
        inn = cur_x @ p["w_ih"][i, 2] + p["b_ih"][i, 2]
        hr = h @ p["w_hh"][i, 0] + p["b_hh"][i, 0]
        hz = h @ p["w_hh"][i, 1] + p["b_hh"][i, 1]
        hn = h @ p["w_hh"][i, 2] + p["b_hh"][i, 2]
        r = jax.nn.sigmoid(ir + hr)
        z = jax.nn.sigmoid(iz + hz)
        n = jnp.tanh(inn + r * hn)
        cur_h = (1.0 - z) * n + z * h
        mu = jnp.mean(cur_h, axis=-1, keepdims=True)
        var = jnp.mean((cur_h - mu) ** 2, axis=-1, keepdims=True)
        normed = (cur_h - mu) / jnp.sqrt(var + LN_EPS)
        normed = normed * p["ln_w"][i] + p["ln_b"][i]
        cur_x = cur_x + normed
        ret = ret + p["s"][0, i + 1] * cur_h
    return p["gamma"][0, 0] * ret


if __name__ == "__main__":
    key = jax.random.PRNGKey(0)
    k_in, k_h, k_p = jax.random.split(key, 3)

    x = jax.random.normal(k_in, (BATCH, STATE_DIM), jnp.float32)          # input
    hiddens = jax.random.normal(k_h, (LAYERS, BATCH, HIDDEN), jnp.float32)
    params = init_params(k_p)

    out = elmo_forward(x, hiddens, params)
    out = jax.block_until_ready(out)

    ref = elmo_reference(x, hiddens, params)
    assert out.shape == (BATCH, HIDDEN)
    assert jnp.allclose(out, ref, atol=1e-5, rtol=1e-5), "mismatch vs reference"

    print("KERNEL_OK")
</pallas_src>

<mosaic_0001>
module attributes {stable_mosaic.version = 11 : i64} {
  func.func @elmo_kernel(%arg0: memref<8x16xf32, #tpu.memory_space<vmem>>, %arg1: memref<3x8x32xf32, #tpu.memory_space<vmem>>, %arg2: memref<16x32xf32, #tpu.memory_space<vmem>>, %arg3: memref<1x32xf32, #tpu.memory_space<vmem>>, %arg4: memref<3x32x96xf32, #tpu.memory_space<vmem>>, %arg5: memref<3x32x96xf32, #tpu.memory_space<vmem>>, %arg6: memref<3x1x96xf32, #tpu.memory_space<vmem>>, %arg7: memref<3x1x32xf32, #tpu.memory_space<vmem>>, %arg8: memref<3x1x32xf32, #tpu.memory_space<vmem>>, %arg9: memref<3x1x32xf32, #tpu.memory_space<vmem>>, %arg10: memref<4xf32, #tpu.memory_space<smem>>, %arg11: memref<8x32xf32, #tpu.memory_space<vmem>>) attributes {dimension_semantics = [], scalar_prefetch = 0 : i64, scratch_operands = 0 : i64, tpu.core_type = #tpu.core_type<tc>} {
    %c0 = arith.constant 0 : index
    %c0_0 = arith.constant 0 : index
    %0 = vector.load %arg0[%c0, %c0_0] : memref<8x16xf32, #tpu.memory_space<vmem>>, vector<8x16xf32>
    %c0_1 = arith.constant 0 : index
    %c0_2 = arith.constant 0 : index
    %1 = vector.load %arg2[%c0_1, %c0_2] : memref<16x32xf32, #tpu.memory_space<vmem>>, vector<16x32xf32>
    %cst = arith.constant dense<0.000000e+00> : vector<8x32xf32>
    %2 = tpu.matmul %0, %1, %cst {dimension_numbers = #tpu.dot_dimension_numbers<[1], [0], [0], [1], [0, 0, 1, 1], [], []>} : vector<8x16xf32>, vector<16x32xf32>, vector<8x32xf32> -> vector<8x32xf32>
    %c0_3 = arith.constant 0 : index
    %c0_4 = arith.constant 0 : index
    %3 = vector.load %arg3[%c0_3, %c0_4] : memref<1x32xf32, #tpu.memory_space<vmem>>, vector<1x32xf32>
    %4 = vector.broadcast %3 : vector<1x32xf32> to vector<8x32xf32>
    %5 = arith.addf %2, %4 : vector<8x32xf32>
    %c0_5 = arith.constant 0 : index
    %6 = memref.load %arg10[%c0_5] : memref<4xf32, #tpu.memory_space<smem>>
    %7 = vector.broadcast %6 : f32 to vector<8x32xf32>
    %8 = arith.mulf %7, %5 : vector<8x32xf32>
    %c0_6 = arith.constant 0 : index
    %c0_7 = arith.constant 0 : index
    %c0_8 = arith.constant 0 : index
    %9 = vector.load %arg1[%c0_6, %c0_7, %c0_8] : memref<3x8x32xf32, #tpu.memory_space<vmem>>, vector<1x8x32xf32>
    %10 = vector.shape_cast %9 : vector<1x8x32xf32> to vector<8x32xf32>
    %c0_9 = arith.constant 0 : index
    %c0_10 = arith.constant 0 : index
    %c0_11 = arith.constant 0 : index
    %11 = vector.load %arg4[%c0_9, %c0_10, %c0_11] : memref<3x32x96xf32, #tpu.memory_space<vmem>>, vector<1x32x96xf32>
    %12 = vector.shape_cast %11 : vector<1x32x96xf32> to vector<32x96xf32>
    %cst_12 = arith.constant dense<0.000000e+00> : vector<8x96xf32>
    %13 = tpu.matmul %5, %12, %cst_12 {dimension_numbers = #tpu.dot_dimension_numbers<[1], [0], [0], [1], [0, 0, 1, 1], [], []>} : vector<8x32xf32>, vector<32x96xf32>, vector<8x96xf32> -> vector<8x96xf32>
    %c0_13 = arith.constant 0 : index
    %c0_14 = arith.constant 0 : index
    %c0_15 = arith.constant 0 : index
    %14 = vector.load %arg6[%c0_13, %c0_14, %c0_15] : memref<3x1x96xf32, #tpu.memory_space<vmem>>, vector<1x1x96xf32>
    %15 = vector.shape_cast %14 : vector<1x1x96xf32> to vector<1x96xf32>
    %16 = vector.broadcast %15 : vector<1x96xf32> to vector<8x96xf32>
    %17 = arith.addf %13, %16 : vector<8x96xf32>
    %c0_16 = arith.constant 0 : index
    %c0_17 = arith.constant 0 : index
    %c0_18 = arith.constant 0 : index
    %18 = vector.load %arg5[%c0_16, %c0_17, %c0_18] : memref<3x32x96xf32, #tpu.memory_space<vmem>>, vector<1x32x96xf32>
    %19 = vector.shape_cast %18 : vector<1x32x96xf32> to vector<32x96xf32>
    %cst_19 = arith.constant dense<0.000000e+00> : vector<8x96xf32>
    %20 = tpu.matmul %10, %19, %cst_19 {dimension_numbers = #tpu.dot_dimension_numbers<[1], [0], [0], [1], [0, 0, 1, 1], [], []>} : vector<8x32xf32>, vector<32x96xf32>, vector<8x96xf32> -> vector<8x96xf32>
    %21 = vector.extract_strided_slice %17 {offsets = [0, 0], sizes = [8, 32], strides = [1, 1]} : vector<8x96xf32> to vector<8x32xf32>
    %22 = vector.extract_strided_slice %20 {offsets = [0, 0], sizes = [8, 32], strides = [1, 1]} : vector<8x96xf32> to vector<8x32xf32>
    %23 = arith.addf %21, %22 : vector<8x32xf32>
    %24 = arith.negf %23 : vector<8x32xf32>
    %25 = math.exp %24 : vector<8x32xf32>
    %cst_20 = arith.constant 1.000000e+00 : f32
    %26 = vector.broadcast %cst_20 : f32 to vector<8x32xf32>
    %27 = arith.addf %26, %25 : vector<8x32xf32>
    %28 = arith.divf %26, %27 : vector<8x32xf32>
    %29 = vector.extract_strided_slice %17 {offsets = [0, 32], sizes = [8, 32], strides = [1, 1]} : vector<8x96xf32> to vector<8x32xf32>
    %30 = vector.extract_strided_slice %20 {offsets = [0, 32], sizes = [8, 32], strides = [1, 1]} : vector<8x96xf32> to vector<8x32xf32>
    %31 = arith.addf %29, %30 : vector<8x32xf32>
    %32 = arith.negf %31 : vector<8x32xf32>
    %33 = math.exp %32 : vector<8x32xf32>
    %cst_21 = arith.constant 1.000000e+00 : f32
    %34 = vector.broadcast %cst_21 : f32 to vector<8x32xf32>
    %35 = arith.addf %34, %33 : vector<8x32xf32>
    %36 = arith.divf %34, %35 : vector<8x32xf32>
    %37 = vector.extract_strided_slice %17 {offsets = [0, 64], sizes = [8, 32], strides = [1, 1]} : vector<8x96xf32> to vector<8x32xf32>
    %38 = vector.extract_strided_slice %20 {offsets = [0, 64], sizes = [8, 32], strides = [1, 1]} : vector<8x96xf32> to vector<8x32xf32>
    %c0_22 = arith.constant 0 : index
    %c0_23 = arith.constant 0 : index
    %c0_24 = arith.constant 0 : index
    %39 = vector.load %arg7[%c0_22, %c0_23, %c0_24] : memref<3x1x32xf32, #tpu.memory_space<vmem>>, vector<1x1x32xf32>
    %40 = vector.shape_cast %39 : vector<1x1x32xf32> to vector<1x32xf32>
    %41 = vector.broadcast %40 : vector<1x32xf32> to vector<8x32xf32>
    %42 = arith.addf %38, %41 : vector<8x32xf32>
    %43 = arith.mulf %28, %42 : vector<8x32xf32>
    %44 = arith.addf %37, %43 : vector<8x32xf32>
    %45 = math.tanh %44 : vector<8x32xf32>
    %cst_25 = arith.constant 1.000000e+00 : f32
    %46 = vector.broadcast %cst_25 : f32 to vector<8x32xf32>
    %47 = arith.subf %46, %36 : vector<8x32xf32>
    %48 = arith.mulf %47, %45 : vector<8x32xf32>
    %49 = arith.mulf %36, %10 : vector<8x32xf32>
    %50 = arith.addf %48, %49 : vector<8x32xf32>
    %cst_26 = arith.constant dense<0.000000e+00> : vector<8xf32>
    %51 = vector.multi_reduction <add>, %50, %cst_26 [1] : vector<8x32xf32> to vector<8xf32>
    %52 = vector.shape_cast %51 : vector<8xf32> to vector<8x1xf32>
    %cst_27 = arith.constant 3.200000e+01 : f32
    %53 = vector.broadcast %cst_27 : f32 to vector<8x1xf32>
    %54 = arith.divf %52, %53 : vector<8x1xf32>
    %55 = vector.broadcast %54 : vector<8x1xf32> to vector<8x32xf32>
    %56 = arith.subf %50, %55 : vector<8x32xf32>
    %57 = arith.mulf %56, %56 : vector<8x32xf32>
    %cst_28 = arith.constant dense<0.000000e+00> : vector<8xf32>
    %58 = vector.multi_reduction <add>, %57, %cst_28 [1] : vector<8x32xf32> to vector<8xf32>
    %59 = vector.shape_cast %58 : vector<8xf32> to vector<8x1xf32>
    %cst_29 = arith.constant 3.200000e+01 : f32
    %60 = vector.broadcast %cst_29 : f32 to vector<8x1xf32>
    %61 = arith.divf %59, %60 : vector<8x1xf32>
    %62 = vector.broadcast %54 : vector<8x1xf32> to vector<8x32xf32>
    %63 = arith.subf %50, %62 : vector<8x32xf32>
    %cst_30 = arith.constant 9.99999974E-6 : f32
    %64 = vector.broadcast %cst_30 : f32 to vector<8x1xf32>
    %65 = arith.addf %61, %64 : vector<8x1xf32>
    %66 = math.rsqrt %65 : vector<8x1xf32>
    %67 = vector.broadcast %66 : vector<8x1xf32> to vector<8x32xf32>
    %68 = arith.mulf %63, %67 : vector<8x32xf32>
    %c0_31 = arith.constant 0 : index
    %c0_32 = arith.constant 0 : index
    %c0_33 = arith.constant 0 : index
    %69 = vector.load %arg8[%c0_31, %c0_32, %c0_33] : memref<3x1x32xf32, #tpu.memory_space<vmem>>, vector<1x1x32xf32>
    %70 = vector.shape_cast %69 : vector<1x1x32xf32> to vector<1x32xf32>
    %71 = vector.broadcast %70 : vector<1x32xf32> to vector<8x32xf32>
    %72 = arith.mulf %68, %71 : vector<8x32xf32>
    %c0_34 = arith.constant 0 : index
    %c0_35 = arith.constant 0 : index
    %c0_36 = arith.constant 0 : index
    %73 = vector.load %arg9[%c0_34, %c0_35, %c0_36] : memref<3x1x32xf32, #tpu.memory_space<vmem>>, vector<1x1x32xf32>
    %74 = vector.shape_cast %73 : vector<1x1x32xf32> to vector<1x32xf32>
    %75 = vector.broadcast %74 : vector<1x32xf32> to vector<8x32xf32>
    %76 = arith.addf %72, %75 : vector<8x32xf32>
    %77 = arith.addf %5, %76 : vector<8x32xf32>
    %c1 = arith.constant 1 : index
    %78 = memref.load %arg10[%c1] : memref<4xf32, #tpu.memory_space<smem>>
    %79 = vector.broadcast %78 : f32 to vector<8x32xf32>
    %80 = arith.mulf %79, %50 : vector<8x32xf32>
    %81 = arith.addf %8, %80 : vector<8x32xf32>
    %c1_37 = arith.constant 1 : index
    %c0_38 = arith.constant 0 : index
    %c0_39 = arith.constant 0 : index
    %82 = vector.load %arg1[%c1_37, %c0_38, %c0_39] : memref<3x8x32xf32, #tpu.memory_space<vmem>>, vector<1x8x32xf32>
    %83 = vector.shape_cast %82 : vector<1x8x32xf32> to vector<8x32xf32>
    %c1_40 = arith.constant 1 : index
    %c0_41 = arith.constant 0 : index
    %c0_42 = arith.constant 0 : index
    %84 = vector.load %arg4[%c1_40, %c0_41, %c0_42] : memref<3x32x96xf32, #tpu.memory_space<vmem>>, vector<1x32x96xf32>
    %85 = vector.shape_cast %84 : vector<1x32x96xf32> to vector<32x96xf32>
    %cst_43 = arith.constant dense<0.000000e+00> : vector<8x96xf32>
    %86 = tpu.matmul %77, %85, %cst_43 {dimension_numbers = #tpu.dot_dimension_numbers<[1], [0], [0], [1], [0, 0, 1, 1], [], []>} : vector<8x32xf32>, vector<32x96xf32>, vector<8x96xf32> -> vector<8x96xf32>
    %c1_44 = arith.constant 1 : index
    %c0_45 = arith.constant 0 : index
    %c0_46 = arith.constant 0 : index
    %87 = vector.load %arg6[%c1_44, %c0_45, %c0_46] : memref<3x1x96xf32, #tpu.memory_space<vmem>>, vector<1x1x96xf32>
    %88 = vector.shape_cast %87 : vector<1x1x96xf32> to vector<1x96xf32>
    %89 = vector.broadcast %88 : vector<1x96xf32> to vector<8x96xf32>
    %90 = arith.addf %86, %89 : vector<8x96xf32>
    %c1_47 = arith.constant 1 : index
    %c0_48 = arith.constant 0 : index
    %c0_49 = arith.constant 0 : index
    %91 = vector.load %arg5[%c1_47, %c0_48, %c0_49] : memref<3x32x96xf32, #tpu.memory_space<vmem>>, vector<1x32x96xf32>
    %92 = vector.shape_cast %91 : vector<1x32x96xf32> to vector<32x96xf32>
    %cst_50 = arith.constant dense<0.000000e+00> : vector<8x96xf32>
    %93 = tpu.matmul %83, %92, %cst_50 {dimension_numbers = #tpu.dot_dimension_numbers<[1], [0], [0], [1], [0, 0, 1, 1], [], []>} : vector<8x32xf32>, vector<32x96xf32>, vector<8x96xf32> -> vector<8x96xf32>
    %94 = vector.extract_strided_slice %90 {offsets = [0, 0], sizes = [8, 32], strides = [1, 1]} : vector<8x96xf32> to vector<8x32xf32>
    %95 = vector.extract_strided_slice %93 {offsets = [0, 0], sizes = [8, 32], strides = [1, 1]} : vector<8x96xf32> to vector<8x32xf32>
    %96 = arith.addf %94, %95 : vector<8x32xf32>
    %97 = arith.negf %96 : vector<8x32xf32>
    %98 = math.exp %97 : vector<8x32xf32>
    %cst_51 = arith.constant 1.000000e+00 : f32
    %99 = vector.broadcast %cst_51 : f32 to vector<8x32xf32>
    %100 = arith.addf %99, %98 : vector<8x32xf32>
    %101 = arith.divf %99, %100 : vector<8x32xf32>
    %102 = vector.extract_strided_slice %90 {offsets = [0, 32], sizes = [8, 32], strides = [1, 1]} : vector<8x96xf32> to vector<8x32xf32>
    %103 = vector.extract_strided_slice %93 {offsets = [0, 32], sizes = [8, 32], strides = [1, 1]} : vector<8x96xf32> to vector<8x32xf32>
    %104 = arith.addf %102, %103 : vector<8x32xf32>
    %105 = arith.negf %104 : vector<8x32xf32>
    %106 = math.exp %105 : vector<8x32xf32>
    %cst_52 = arith.constant 1.000000e+00 : f32
    %107 = vector.broadcast %cst_52 : f32 to vector<8x32xf32>
    %108 = arith.addf %107, %106 : vector<8x32xf32>
    %109 = arith.divf %107, %108 : vector<8x32xf32>
    %110 = vector.extract_strided_slice %90 {offsets = [0, 64], sizes = [8, 32], strides = [1, 1]} : vector<8x96xf32> to vector<8x32xf32>
    %111 = vector.extract_strided_slice %93 {offsets = [0, 64], sizes = [8, 32], strides = [1, 1]} : vector<8x96xf32> to vector<8x32xf32>
    %c1_53 = arith.constant 1 : index
    %c0_54 = arith.constant 0 : index
    %c0_55 = arith.constant 0 : index
    %112 = vector.load %arg7[%c1_53, %c0_54, %c0_55] : memref<3x1x32xf32, #tpu.memory_space<vmem>>, vector<1x1x32xf32>
    %113 = vector.shape_cast %112 : vector<1x1x32xf32> to vector<1x32xf32>
    %114 = vector.broadcast %113 : vector<1x32xf32> to vector<8x32xf32>
    %115 = arith.addf %111, %114 : vector<8x32xf32>
    %116 = arith.mulf %101, %115 : vector<8x32xf32>
    %117 = arith.addf %110, %116 : vector<8x32xf32>
    %118 = math.tanh %117 : vector<8x32xf32>
    %cst_56 = arith.constant 1.000000e+00 : f32
    %119 = vector.broadcast %cst_56 : f32 to vector<8x32xf32>
    %120 = arith.subf %119, %109 : vector<8x32xf32>
    %121 = arith.mulf %120, %118 : vector<8x32xf32>
    %122 = arith.mulf %109, %83 : vector<8x32xf32>
    %123 = arith.addf %121, %122 : vector<8x32xf32>
    %cst_57 = arith.constant dense<0.000000e+00> : vector<8xf32>
    %124 = vector.multi_reduction <add>, %123, %cst_57 [1] : vector<8x32xf32> to vector<8xf32>
    %125 = vector.shape_cast %124 : vector<8xf32> to vector<8x1xf32>
    %cst_58 = arith.constant 3.200000e+01 : f32
    %126 = vector.broadcast %cst_58 : f32 to vector<8x1xf32>
    %127 = arith.divf %125, %126 : vector<8x1xf32>
    %128 = vector.broadcast %127 : vector<8x1xf32> to vector<8x32xf32>
    %129 = arith.subf %123, %128 : vector<8x32xf32>
    %130 = arith.mulf %129, %129 : vector<8x32xf32>
    %cst_59 = arith.constant dense<0.000000e+00> : vector<8xf32>
    %131 = vector.multi_reduction <add>, %130, %cst_59 [1] : vector<8x32xf32> to vector<8xf32>
    %132 = vector.shape_cast %131 : vector<8xf32> to vector<8x1xf32>
    %cst_60 = arith.constant 3.200000e+01 : f32
    %133 = vector.broadcast %cst_60 : f32 to vector<8x1xf32>
    %134 = arith.divf %132, %133 : vector<8x1xf32>
    %135 = vector.broadcast %127 : vector<8x1xf32> to vector<8x32xf32>
    %136 = arith.subf %123, %135 : vector<8x32xf32>
    %cst_61 = arith.constant 9.99999974E-6 : f32
    %137 = vector.broadcast %cst_61 : f32 to vector<8x1xf32>
    %138 = arith.addf %134, %137 : vector<8x1xf32>
    %139 = math.rsqrt %138 : vector<8x1xf32>
    %140 = vector.broadcast %139 : vector<8x1xf32> to vector<8x32xf32>
    %141 = arith.mulf %136, %140 : vector<8x32xf32>
    %c1_62 = arith.constant 1 : index
    %c0_63 = arith.constant 0 : index
    %c0_64 = arith.constant 0 : index
    %142 = vector.load %arg8[%c1_62, %c0_63, %c0_64] : memref<3x1x32xf32, #tpu.memory_space<vmem>>, vector<1x1x32xf32>
    %143 = vector.shape_cast %142 : vector<1x1x32xf32> to vector<1x32xf32>
    %144 = vector.broadcast %143 : vector<1x32xf32> to vector<8x32xf32>
    %145 = arith.mulf %141, %144 : vector<8x32xf32>
    %c1_65 = arith.constant 1 : index
    %c0_66 = arith.constant 0 : index
    %c0_67 = arith.constant 0 : index
    %146 = vector.load %arg9[%c1_65, %c0_66, %c0_67] : memref<3x1x32xf32, #tpu.memory_space<vmem>>, vector<1x1x32xf32>
    %147 = vector.shape_cast %146 : vector<1x1x32xf32> to vector<1x32xf32>
    %148 = vector.broadcast %147 : vector<1x32xf32> to vector<8x32xf32>
    %149 = arith.addf %145, %148 : vector<8x32xf32>
    %150 = arith.addf %77, %149 : vector<8x32xf32>
    %c2 = arith.constant 2 : index
    %151 = memref.load %arg10[%c2] : memref<4xf32, #tpu.memory_space<smem>>
    %152 = vector.broadcast %151 : f32 to vector<8x32xf32>
    %153 = arith.mulf %152, %123 : vector<8x32xf32>
    %154 = arith.addf %81, %153 : vector<8x32xf32>
    %c2_68 = arith.constant 2 : index
    %c0_69 = arith.constant 0 : index
    %c0_70 = arith.constant 0 : index
    %155 = vector.load %arg1[%c2_68, %c0_69, %c0_70] : memref<3x8x32xf32, #tpu.memory_space<vmem>>, vector<1x8x32xf32>
    %156 = vector.shape_cast %155 : vector<1x8x32xf32> to vector<8x32xf32>
    %c2_71 = arith.constant 2 : index
    %c0_72 = arith.constant 0 : index
    %c0_73 = arith.constant 0 : index
    %157 = vector.load %arg4[%c2_71, %c0_72, %c0_73] : memref<3x32x96xf32, #tpu.memory_space<vmem>>, vector<1x32x96xf32>
    %158 = vector.shape_cast %157 : vector<1x32x96xf32> to vector<32x96xf32>
    %cst_74 = arith.constant dense<0.000000e+00> : vector<8x96xf32>
    %159 = tpu.matmul %150, %158, %cst_74 {dimension_numbers = #tpu.dot_dimension_numbers<[1], [0], [0], [1], [0, 0, 1, 1], [], []>} : vector<8x32xf32>, vector<32x96xf32>, vector<8x96xf32> -> vector<8x96xf32>
    %c2_75 = arith.constant 2 : index
    %c0_76 = arith.constant 0 : index
    %c0_77 = arith.constant 0 : index
    %160 = vector.load %arg6[%c2_75, %c0_76, %c0_77] : memref<3x1x96xf32, #tpu.memory_space<vmem>>, vector<1x1x96xf32>
    %161 = vector.shape_cast %160 : vector<1x1x96xf32> to vector<1x96xf32>
    %162 = vector.broadcast %161 : vector<1x96xf32> to vector<8x96xf32>
    %163 = arith.addf %159, %162 : vector<8x96xf32>
    %c2_78 = arith.constant 2 : index
    %c0_79 = arith.constant 0 : index
    %c0_80 = arith.constant 0 : index
    %164 = vector.load %arg5[%c2_78, %c0_79, %c0_80] : memref<3x32x96xf32, #tpu.memory_space<vmem>>, vector<1x32x96xf32>
    %165 = vector.shape_cast %164 : vector<1x32x96xf32> to vector<32x96xf32>
    %cst_81 = arith.constant dense<0.000000e+00> : vector<8x96xf32>
    %166 = tpu.matmul %156, %165, %cst_81 {dimension_numbers = #tpu.dot_dimension_numbers<[1], [0], [0], [1], [0, 0, 1, 1], [], []>} : vector<8x32xf32>, vector<32x96xf32>, vector<8x96xf32> -> vector<8x96xf32>
    %167 = vector.extract_strided_slice %163 {offsets = [0, 0], sizes = [8, 32], strides = [1, 1]} : vector<8x96xf32> to vector<8x32xf32>
    %168 = vector.extract_strided_slice %166 {offsets = [0, 0], sizes = [8, 32], strides = [1, 1]} : vector<8x96xf32> to vector<8x32xf32>
    %169 = arith.addf %167, %168 : vector<8x32xf32>
    %170 = arith.negf %169 : vector<8x32xf32>
    %171 = math.exp %170 : vector<8x32xf32>
    %cst_82 = arith.constant 1.000000e+00 : f32
    %172 = vector.broadcast %cst_82 : f32 to vector<8x32xf32>
    %173 = arith.addf %172, %171 : vector<8x32xf32>
    %174 = arith.divf %172, %173 : vector<8x32xf32>
    %175 = vector.extract_strided_slice %163 {offsets = [0, 32], sizes = [8, 32], strides = [1, 1]} : vector<8x96xf32> to vector<8x32xf32>
    %176 = vector.extract_strided_slice %166 {offsets = [0, 32], sizes = [8, 32], strides = [1, 1]} : vector<8x96xf32> to vector<8x32xf32>
    %177 = arith.addf %175, %176 : vector<8x32xf32>
    %178 = arith.negf %177 : vector<8x32xf32>
    %179 = math.exp %178 : vector<8x32xf32>
    %cst_83 = arith.constant 1.000000e+00 : f32
    %180 = vector.broadcast %cst_83 : f32 to vector<8x32xf32>
    %181 = arith.addf %180, %179 : vector<8x32xf32>
    %182 = arith.divf %180, %181 : vector<8x32xf32>
    %183 = vector.extract_strided_slice %163 {offsets = [0, 64], sizes = [8, 32], strides = [1, 1]} : vector<8x96xf32> to vector<8x32xf32>
    %184 = vector.extract_strided_slice %166 {offsets = [0, 64], sizes = [8, 32], strides = [1, 1]} : vector<8x96xf32> to vector<8x32xf32>
    %c2_84 = arith.constant 2 : index
    %c0_85 = arith.constant 0 : index
    %c0_86 = arith.constant 0 : index
    %185 = vector.load %arg7[%c2_84, %c0_85, %c0_86] : memref<3x1x32xf32, #tpu.memory_space<vmem>>, vector<1x1x32xf32>
    %186 = vector.shape_cast %185 : vector<1x1x32xf32> to vector<1x32xf32>
    %187 = vector.broadcast %186 : vector<1x32xf32> to vector<8x32xf32>
    %188 = arith.addf %184, %187 : vector<8x32xf32>
    %189 = arith.mulf %174, %188 : vector<8x32xf32>
    %190 = arith.addf %183, %189 : vector<8x32xf32>
    %191 = math.tanh %190 : vector<8x32xf32>
    %cst_87 = arith.constant 1.000000e+00 : f32
    %192 = vector.broadcast %cst_87 : f32 to vector<8x32xf32>
    %193 = arith.subf %192, %182 : vector<8x32xf32>
    %194 = arith.mulf %193, %191 : vector<8x32xf32>
    %195 = arith.mulf %182, %156 : vector<8x32xf32>
    %196 = arith.addf %194, %195 : vector<8x32xf32>
    %c3 = arith.constant 3 : index
    %197 = memref.load %arg10[%c3] : memref<4xf32, #tpu.memory_space<smem>>
    %198 = vector.broadcast %197 : f32 to vector<8x32xf32>
    %199 = arith.mulf %198, %196 : vector<8x32xf32>
    %200 = arith.addf %154, %199 : vector<8x32xf32>
    %c0_88 = arith.constant 0 : index
    %c0_89 = arith.constant 0 : index
    %201 = vector.load %arg11[%c0_88, %c0_89] : memref<8x32xf32, #tpu.memory_space<vmem>>, vector<8x32xf32>
    tpu.vector_store %arg11[%c0_88, %c0_89], %200 {strides = array<i32>} : memref<8x32xf32, #tpu.memory_space<vmem>>, vector<8x32xf32>,
    return
  }
}

</mosaic_0001>

<bundles_post_ra>
// kernel: tpu_custom_call.1
= control target key start
LH: loop header
LB: loop body
LE: loop exit
PB: predicated region body
PF: predicated region fallthrough
CT: control target
= control target key end

     0   :  { %16 = vsyncpa [#allocation3], 0  ;;  %s1603_s0 = inlined_call_operand.hbm [shape: f32[8,16], index: 0, kind: input, shape index: {}]   ;;  %s1604_s1 = inlined_call_operand.hbm [shape: f32[3,8,32], index: 1, kind: input, shape index: {}]   ;;  %s1605_s2 = inlined_call_operand.hbm [shape: f32[16,32], index: 2, kind: input, shape index: {}]   ;;  %s1606_s3 = inlined_call_operand.vmem [shape: f32[1,32], index: 3, kind: input, shape index: {}]   ;;  %s1607_s4 = inlined_call_operand.hbm [shape: f32[3,32,96], index: 4, kind: input, shape index: {}]   ;;  %s1608_s5 = inlined_call_operand.hbm [shape: f32[3,32,96], index: 5, kind: input, shape index: {}]   ;;  %s1609_s6 = inlined_call_operand.vmem [shape: f32[3,1,96], index: 6, kind: input, shape index: {}]   ;;  %s1610_s7 = inlined_call_operand.vmem [shape: f32[3,1,32], index: 7, kind: input, shape index: {}]   ;;  %s1611_s8 = inlined_call_operand.vmem [shape: f32[3,1,32], index: 8, kind: input, shape index: {}]   ;;  %s1612_s9 = inlined_call_operand.vmem [shape: f32[3,1,32], index: 9, kind: input, shape index: {}]   ;;  %s1613_s10 = inlined_call_operand.vmem [shape: f32[4], index: 10, kind: input, shape index: {}]   ;;  %s1614_s11 = inlined_call_operand.hbm [shape: f32[8,32], index: 11, kind: output, shape index: {}]  }
   0x1   :  { %17 = vsyncpa [#allocation7], 0 }
   0x2   :  { %18 = vsyncpa [#allocation10], 0 }
   0x3   :  { %19 = vsyncpa [#allocation5], 0 }
   0x4   :  { %20 = vsyncpa [#allocation4], 0  ;;  %s1323_s17 = smov [#allocation6]   ;;  %s1169_s21 = scalar_lea.hbm %s1604_s1, 384 }
   0x5   :  { %s36_s18 = sshll.u32 %s1323_s17, 4  ;;  %p1170_p0 = scmp.ne.s32.totalorder %s1604_s1, %s1169_s21  ;;  %s37_s18 = int_to_ptr.vmem [resolvable:$true] %s36_s18 }
   0x6   :  { %p1173_p1 = scmp.lt.u32.totalorder %s1169_s21, %s1604_s1 }
   0x8   :  { %p1175_p2 = pnand %p1173_p1, %p1170_p0 }
   0xa   :  { %1178 = shalt.err (!%p1175_p2)
}
   0xb   :  { %s1179_s26 = scalar_lea.vmem %s37_s18, 384  ;;  %p1184_p4 = scmp.lt.s32.totalorder %s37_s18, %s37_s18 }
   0xc   :  { %p1180_p3 = scmp.ne.s32.totalorder %s37_s18, %s1179_s26  ;;  %p1185_p5 = scmp.lt.s32.totalorder %s1179_s26, %s1179_s26 }
   0xe   :  { %p1186_p6 = por %p1185_p5, %p1184_p4 }
  0x10   :  { %p1187_p7 = pnand %p1186_p6, %p1180_p3 }
  0x12   :  { %1190 = shalt.err (!%p1187_p7)
}
  0x13   :  { %s1324_s27 = smov 128   ;;  %s1325_s28 = smov 8  }
  0x14   :  { %42 = dma.hbm_to_vmem [thread:$0]  %s1604_s1, 384, %s37_s18, [#allocation7], %s1324_s27, %s1324_s27, %s1325_s28  }
  0x15   :  { %s1326_s12 = smov [#allocation9]   ;;  %s1327_s14 = smov [#allocation2]  }
  0x16   :  { %s62_s13 = sshll.u32 %s1326_s12, 4  ;;  %s27_s15 = sshll.u32 %s1327_s14, 4  ;;  %s63_s13 = int_to_ptr.vmem [resolvable:$true] %s62_s13  ;;  %s28_s15 = int_to_ptr.vmem [resolvable:$true] %s27_s15 }
  0x17   :  { %s1191_s19 = scalar_lea.hbm %s1607_s4, 1536 }
  0x18   :  { %p1192_p8 = scmp.ne.s32.totalorder %s1607_s4, %s1191_s19  ;;  %p1195_p9 = scmp.lt.u32.totalorder %s1191_s19, %s1607_s4 }
  0x1a   :  { %p1197_p10 = pnand %p1195_p9, %p1192_p8 }
  0x1c   :  { %1200 = shalt.err (!%p1197_p10)
}
  0x1d   :  { %s1201_s1 = scalar_lea.vmem %s63_s13, 1536  ;;  %p1206_p12 = scmp.lt.s32.totalorder %s63_s13, %s63_s13 }
  0x1e   :  { %p1202_p11 = scmp.ne.s32.totalorder %s63_s13, %s1201_s1  ;;  %p1207_p13 = scmp.lt.s32.totalorder %s1201_s1, %s1201_s1 }
  0x20   :  { %p1208_p0 = por %p1207_p13, %p1206_p12 }
  0x22   :  { %p1209_p1 = pnand %p1208_p0, %p1202_p11 }
  0x24   :  { %1212 = shalt.err (!%p1209_p1)
}
  0x25   :  { %68 = dma.hbm_to_vmem [thread:$0]  %s1607_s4, 1536, %s63_s13, [#allocation10], %s1324_s27, %s1324_s27, %s1325_s28  }
  0x26   :  { %s1213_s29 = scalar_lea.hbm %s1603_s0, 128 }
  0x27   :  { %p1214_p2 = scmp.ne.s32.totalorder %s1603_s0, %s1213_s29  ;;  %p1217_p3 = scmp.lt.u32.totalorder %s1213_s29, %s1603_s0 }
  0x29   :  { %p1219_p4 = pnand %p1217_p3, %p1214_p2 }
  0x2b   :  { %1222 = shalt.err (!%p1219_p4)
}
  0x2c   :  { %s1223_s17 = scalar_lea.vmem %s28_s15, 128  ;;  %p1228_p6 = scmp.lt.s32.totalorder %s28_s15, %s28_s15 }
  0x2d   :  { %p1224_p5 = scmp.ne.s32.totalorder %s28_s15, %s1223_s17  ;;  %p1229_p7 = scmp.lt.s32.totalorder %s1223_s17, %s1223_s17 }
  0x2f   :  { %p1230_p8 = por %p1229_p7, %p1228_p6 }
  0x31   :  { %p1231_p9 = pnand %p1230_p8, %p1224_p5 }
  0x33   :  { %1234 = shalt.err (!%p1231_p9)
}
  0x34   :  { %30 = dma.hbm_to_vmem [thread:$0]  %s1603_s0, 128, %s28_s15, [#allocation3]  }
  0x35   :  { %s1328_s19 = smov [#allocation8]   ;;  %s1329_s21 = smov [#allocation11]  }
  0x36   :  { %s48_s20 = sshll.u32 %s1328_s19, 4  ;;  %s74_s22 = sshll.u32 %s1329_s21, 4  ;;  %s49_s20 = int_to_ptr.vmem [resolvable:$true] %s48_s20  ;;  %s75_s22 = int_to_ptr.vmem [resolvable:$true] %s74_s22 }
  0x37   :  { %s1235_s18 = scalar_lea.hbm %s1605_s2, 256 }
  0x38   :  { %p1236_p10 = scmp.ne.s32.totalorder %s1605_s2, %s1235_s18  ;;  %p1239_p11 = scmp.lt.u32.totalorder %s1235_s18, %s1605_s2 }
  0x3a   :  { %p1241_p12 = pnand %p1239_p11, %p1236_p10 }
  0x3c   :  { %1244 = shalt.err (!%p1241_p12)
}
  0x3d   :  { %s1245_s0 = scalar_lea.vmem %s49_s20, 256  ;;  %p1250_p0 = scmp.lt.s32.totalorder %s49_s20, %s49_s20 }
  0x3e   :  { %p1246_p13 = scmp.ne.s32.totalorder %s49_s20, %s1245_s0  ;;  %p1251_p1 = scmp.lt.s32.totalorder %s1245_s0, %s1245_s0 }
  0x40   :  { %p1252_p2 = por %p1251_p1, %p1250_p0 }
  0x42   :  { %p1253_p3 = pnand %p1252_p2, %p1246_p13 }
  0x44   :  { %1256 = shalt.err (!%p1253_p3)
}
  0x45   :  { %54 = dma.hbm_to_vmem [thread:$0]  %s1605_s2, 256, %s49_s20, [#allocation7], %s1324_s27, %s1324_s27, %s1325_s28  }
  0x46   :  { %s95_s16 = sshll.u32 %s1613_s10, 4  ;;  %s1257_s13 = scalar_lea.hbm %s1608_s5, 1536  ;;  %s96_s16 = int_to_ptr.vmem [resolvable:$true] %s95_s16 }
  0x47   :  { %p1258_p4 = scmp.ne.s32.totalorder %s1608_s5, %s1257_s13  ;;  %p1261_p5 = scmp.lt.u32.totalorder %s1257_s13, %s1608_s5 }
  0x49   :  { %p1263_p6 = pnand %p1261_p5, %p1258_p4 }
  0x4b   :  { %1266 = shalt.err (!%p1263_p6)
}
  0x4c   :  { %s1267_s2 = scalar_lea.vmem %s75_s22, 1536  ;;  %p1272_p8 = scmp.lt.s32.totalorder %s75_s22, %s75_s22 }
  0x4d   :  { %p1268_p7 = scmp.ne.s32.totalorder %s75_s22, %s1267_s2  ;;  %p1273_p9 = scmp.lt.s32.totalorder %s1267_s2, %s1267_s2 }
  0x4f   :  { %p1274_p10 = por %p1273_p9, %p1272_p8 }
  0x51   :  { %p1275_p11 = pnand %p1274_p10, %p1268_p7 }
  0x53   :  { %1278 = shalt.err (!%p1275_p11)
}
  0x54   :  { %80 = dma.hbm_to_vmem [thread:$0]  %s1608_s5, 1536, %s75_s22, [#allocation10], %s1324_s27, %s1324_s27, %s1325_s28  }
  0x55   :  { %s1279_s18 = scalar_lea.vmem %s96_s16, 16  ;;  %p1284_p13 = scmp.lt.s32.totalorder %s96_s16, %s96_s16 }
  0x56   :  { %p1280_p12 = scmp.ne.s32.totalorder %s96_s16, %s1279_s18  ;;  %p1285_p0 = scmp.lt.s32.totalorder %s1279_s18, %s1279_s18 }
  0x58   :  { %p1286_p1 = por %p1285_p0, %p1284_p13 }
  0x5a   :  { %p1287_p2 = pnand %p1286_p1, %p1280_p12 }
  0x5c   :  { %1290 = shalt.err (!%p1287_p2)
}
  0x5d   :  { %s1330_s24 = smov [#allocation12]  }
  0x5e   :  { %98 = dma.vmem_to_smem %s96_s16, 16, %s1330_s24, [#allocation5]  }
  0x5f   :  { %1313 = dma.done.wait [#allocation3], 128  }
  0x60   :  { %1314 = vsyncadd [#allocation3], 4294967168 }
  0x61   :  { %1315 = dma.done.wait [#allocation7], 640  }
  0x62   :  { %1316 = vsyncadd [#allocation7], 4294966656 }
  0x63   :  { %1317 = dma.done.wait [#allocation10], 3072  }
  0x64   :  { %1318 = vsyncadd [#allocation10], 4294964224 }
  0x65   :  { %1319 = dma.done.wait [#allocation5], 16  }
  0x66   :  { %1320 = vsyncadd [#allocation5], 4294967280 }
  0x67   :  { %117 = sfence }
  0x68   :  { %v119_v0 = vld [vmem:[#allocation8] sm:$0xff]  ;;  %v120_v1 = vld [vmem:[#allocation8 + $0x8] sm:$0xff]  ;;  %v1331_v2 = vmov 0.0|0.0   ;;  %vm1332_vm0 = vmmov 0   ;;  %v1333_v4 = vmov 0.0   ;;  %v291_v5 = vld [vmem:[#allocation11] sm:$0xff] }
  0x69   :  { %1093 = vmatprep.subr.bf16.mxu0 %v1331_v2  ;;  %v1094_v3 = vpack.c.bf16 %v120_v1, %v119_v0  ;;  %1024 = vmatprep.mubr.msk.f32.mxu0 %vm1332_vm0, %v1333_v4  ;;  %v292_v6 = vld [vmem:[#allocation11 + $0x8] sm:$0xff]  ;;  %v206_v7 = vld [vmem:[#allocation9] sm:$0xff]  ;;  %v118_v8 = vld [vmem:[#allocation2] sm:$0xff]  ;;  %vm128_vm1 = vcmask 130048   ;;  %vm217_vm2 = vcmask 261120   ;;  %s1334_s28 = smov 64  }
  0x6a   :  { %1096 = vmatprep.subr.bf16.mxu1 %v1331_v2  ;;  %1035 = vmatprep.mubr.msk.f32.mxu1 %vm1332_vm0, %v1333_v4  ;;  %v1103_v9 = vpack.c.bf16 %v292_v6, %v291_v5  ;;  %v207_v10 = vld [vmem:[#allocation9 + $0x8] sm:$0xff]  ;;  %v293_v11 = vld [vmem:[#allocation11 + $0x10] sm:$0xff]  ;;  %v294_v12 = vld [vmem:[#allocation11 + $0x18] sm:$0xff]  ;;  %s1335_s26 = smov 32   ;;  %s1336_s0 = smov 96  }
  0x6b   :  { %1095 = vmatpush3.bf16.msra.mxu0 %v1094_v3  ;;  %v1097_v13 = vpack.c.bf16 %v207_v10, %v206_v7  ;;  %v1106_v14 = vpack.c.bf16 %v294_v12, %v293_v11  ;;  %v205_v15 = vld [vmem:[#allocation6] sm:$0xff]  ;;  %v208_v16 = vld [vmem:[#allocation9 + $0x10] sm:$0xff]  ;;  %v551_v58 = vld [vmem:[#allocation11 + $0x20] sm:$0xff]  ;;  %s986_s20 = sld [smem:[#allocation12 + $0x3]]  ;;  %s202_s18 = sld [smem:[#allocation12]] }
  0x6c   :  { %1102 = vmatprep.subr.bf16.mxu0 %v1331_v2  ;;  %v209_v17 = vld [vmem:[#allocation9 + $0x18] sm:$0xff]  ;;  %v963_v19 = vld [vmem:[%s1610_s7] ss:$0 sm:$0xff]  ;;  %v552_v59 = vld [vmem:[#allocation11 + $0x28] sm:$0xff]  ;;  %s1337_s24 = smov [#allocation13]  }
  0x6d   :  { %1098 = vmatpush3.bf16.msra.mxu1 %v1097_v13  ;;  %v1100_v18 = vpack.c.bf16 %v209_v17, %v208_v16  ;;  %381 = vrot.lane.b32.xlu0 %v963_v19, %s1334_s28  ;;  %v957_v20 = vld [vmem:[%s1606_s3] ss:$0 sm:$0xff]  ;;  %v1115_v61 = vpack.c.bf16 %v552_v59, %v551_v58  ;;  %v554_v62 = vld [vmem:[#allocation11 + $0x38] sm:$0xff]  ;;  %v465_v63 = vld [vmem:[#allocation9 + $0x20] sm:$0xff]  ;;  %s945_s5 = sshll.u32 %s1337_s24, 4  ;;  %s946_s5 = int_to_ptr.vmem [resolvable:$true] %s945_s5 }
  0x6e   :  { %1025 = vmatmul.mubr.msk.f32.vlgmr.msra.gmra.mrb[0].mxu0 %vm128_vm1, %v118_v8  ;;  %1099 = vmatprep.subr.bf16.mxu1 %v1331_v2  ;;  %v959_v28 = vld [vmem:[%s1609_s6] ss:$0 sm:$0xff]  ;;  %v466_v0 = vld [vmem:[#allocation9 + $0x28] sm:$0xff]  ;;  %v468_v3 = vld [vmem:[#allocation9 + $0x38] sm:$0xff]  ;;  %s1291_s27 = scalar_lea.vmem %s946_s5, 128  ;;  %p1296_p4 = scmp.lt.s32.totalorder %s946_s5, %s946_s5 }
  0x6f   :  { %1104 = vmatpush3.bf16.msra.mxu0 %v1103_v9  ;;  %1046 = vmatprep.mubr.msk.f32.mxu0 %vm1332_vm0, %v1333_v4  ;;  %v964_v50 = vld [vmem:[%s1611_s8] ss:$0 sm:$0xff]  ;;  %v1109_v6 = vpack.c.bf16 %v466_v0, %v465_v63  ;;  %v463_v8 = vld [vmem:[#allocation6 + $0x8] sm:$0xff]  ;;  %v730_v0 = vld [vmem:[#allocation9 + $0x58] sm:$0xff]  ;;  %p1292_p3 = scmp.ne.s32.totalorder %s946_s5, %s1291_s27  ;;  %p1297_p5 = scmp.lt.s32.totalorder %s1291_s27, %s1291_s27 }
  0x70   :  { %1105 = vmatprep.subr.bf16.mxu0 %v1331_v2  ;;  %v965_v57 = vld [vmem:[%s1612_s9] ss:$0 sm:$0xff] }
  0x71   :  { %1101 = vmatpush3.bf16.msra.mxu1 %v1100_v18  ;;  %v553_v60 = vld [vmem:[#allocation11 + $0x30] sm:$0xff]  ;;  %p1298_p6 = por %p1297_p5, %p1296_p4 }
  0x72   :  { %1108 = vmatprep.subr.bf16.mxu1 %v1331_v2  ;;  %v467_v1 = vld [vmem:[#allocation9 + $0x30] sm:$0xff]  ;;  %v1118_v5 = vpack.c.bf16 %v554_v62, %v553_v60  ;;  %v816_v60 = vld [vmem:[#allocation11 + $0x58] sm:$0xff]  ;;  %v728_v62 = vld [vmem:[#allocation9 + $0x48] sm:$0xff] }
  0x73   :  { %1107 = vmatpush3.bf16.msra.mxu0 %v1106_v14  ;;  %v1112_v7 = vpack.c.bf16 %v468_v3, %v467_v1  ;;  %v973_v18 = vld [vmem:[%s1610_s7 + $0x1] ss:$0 sm:$0xff]  ;;  %p1299_p7 = pnand %p1298_p6, %p1292_p3 }
  0x74   :  { %1114 = vmatprep.subr.bf16.mxu0 %v1331_v2  ;;  %v815_v58 = vld [vmem:[#allocation11 + $0x50] sm:$0xff] }
  0x75   :  { %v729_v63 = vld [vmem:[#allocation9 + $0x50] sm:$0xff]  ;;  %v1130_v1 = vpack.c.bf16 %v816_v60, %v815_v58 }
  0x76   :  { %1047 = vmatmul.mubr.msk.f32.vlgmr.msra.gmra.mrb[2].mxu0 %vm217_vm2, %v205_v15 }
  0x77   :  { %1068 = vmatprep.mubr.msk.f32.mxu0 %vm1332_vm0, %v1333_v4  ;;  %1116 = vmatpush3.bf16.msra.mxu0 %v1115_v61  ;;  %v727_v61 = vld [vmem:[#allocation9 + $0x40] sm:$0xff] }
  0x78   :  { %1117 = vmatprep.subr.bf16.mxu0 %v1331_v2  ;;  %v1121_v3 = vpack.c.bf16 %v728_v62, %v727_v61 }
  0x7b   :  { %1119 = vmatpush3.bf16.msra.mxu0 %v1118_v5  ;;  %v1124_v5 = vpack.c.bf16 %v730_v0, %v729_v63 }
  0x7c   :  { %1126 = vmatprep.subr.bf16.mxu0 %v1331_v2 }
  0x7e   :  { %1069 = vmatmul.mubr.msk.f32.vlgmr.msra.gmra.mrb[4].mxu0 %vm217_vm2, %v463_v8 }
  0x7f   :  { %1090 = vmatprep.mubr.msk.f32.mxu0 %vm1332_vm0, %v1333_v4 }
  0xdf   :  { %v382_v24 = vpop.permute.xlu0 %381 }
 0x141   :  { %v198_v21 = vpop.f32.mrb[0].mxu0 }
 0x142   :  { %v1496_v22 = vadd.f32 %v957_v20, %v198_v21  ;;  %v1026_v23 = vpop.f32.mrb[1].mxu0 }
 0x144   :  { %1036 = vmatmul.mubr.msk.f32.vlgmr.msra.gmra.mrb[0].mxu1 %vm217_vm2, %v1496_v22 }
 0x145   :  { %1057 = vmatprep.mubr.msk.f32.mxu1 %vm1332_vm0, %v1333_v4  ;;  %1110 = vmatpush3.bf16.msra.mxu1 %v1109_v6  ;;  %v725_v6 = vld [vmem:[#allocation6 + $0x10] sm:$0xff] }
 0x146   :  { %1111 = vmatprep.subr.bf16.mxu1 %v1331_v2 }
 0x149   :  { %v364_v25 = vpop.f32.mrb[2].mxu0  ;;  %1113 = vmatpush3.bf16.msra.mxu1 %v1112_v7 }
 0x14a   :  { %v384_v26 = vadd.f32 %v382_v24, %v364_v25  ;;  %v1048_v27 = vpop.f32.mrb[3].mxu0  ;;  %1120 = vmatprep.subr.bf16.mxu1 %v1331_v2 }
 0x14c   :  { %386 = vrot.lane.b32.xlu0 %v384_v26, %s1334_s28  ;;  %v968_v26 = vld [vmem:[%s1609_s6 + $0x1] ss:$0 sm:$0xff] }
 0x150   :  { %402 = vrot.lane.b32.xlu0 %v205_v15, %s1335_s26 }
 0x151   :  { %v624_v19 = vpop.f32.mrb[4].mxu0 }
 0x152   :  { %v1070_v20 = vpop.f32.mrb[5].mxu0 }
 0x1be   :  { %v387_v37 = vpop.permute.xlu0 %386 }
 0x1c2   :  { %v403_v42 = vpop.permute.xlu0 %402 }
 0x217   :  { %v287_v29 = vpop.f32.mrb[0].mxu1 }
 0x218   :  { %v288_v30 = vadd.f32 %v959_v28, %v287_v29  ;;  %v1037_v31 = vpop.f32.mrb[1].mxu1 }
 0x21a   :  { %v368_v32 = vadd.f32 %v364_v25, %v288_v30 }
 0x21c   :  { %v962_v33 = vmul.f32 -1.442695, %v368_v32 }
 0x21e   :  { %1147 = vpow2.f32 %v962_v33 }
 0x228   :  { %v1148_v34 = vpop.eup %1147 }
 0x229   :  { %v372_v35 = vadd.f32 1.0, %v1148_v34 }
 0x22b   :  { %1149 = vrcp.f32 %v372_v35 }
 0x235   :  { %v1150_v36 = vpop.eup %1149 }
 0x236   :  { %v389_v38 = vmul.f32 %v1150_v36, %v387_v37  ;;  %v396_v43 = vsub.f32 1.0, %v1150_v36  ;;  %v405_v45 = vmul.f32 %v1150_v36, %v403_v42 }
 0x238   :  { %391 = vrot.lane.b32.xlu1 %v389_v38, %s1334_s28 }
 0x2aa   :  { %v392_v39 = vpop.permute.xlu1 %391 }
 0x2ab   :  { %v394_v40 = vadd.f32 %v392_v39, %v288_v30 }
 0x2ad   :  { %1151 = vtanh.f32 %v394_v40 }
 0x2b7   :  { %v1152_v41 = vpop.eup %1151 }
 0x2b8   :  { %398 = vrot.lane.b32.xlu1 %v1152_v41, %s1336_s0 }
 0x32a   :  { %v399_v44 = vpop.permute.xlu1 %398 }
 0x32b   :  { %v401_v46 = vmul.f32 %v399_v44, %v396_v43 }
 0x32d   :  { %v1509_v47 = vadd.f32 %v405_v45, %v401_v46 }
 0x32f   :  { %408 = vrot.lane.b32.xlu1 %v1509_v47, %s1336_s0 }
 0x3a1   :  { %v409_v48 = vpop.permute.xlu1 %408 }
 0x3a2   :  { %v411_v49 = vsel %vm217_vm2, %v409_v48, 0.0  ;;  %v975_v48 = vld [vmem:[%s1611_s8 + $0x1] ss:$0 sm:$0xff] }
 0x3a3   :  { %412 = vadd.xlane.f32.xlu0 %v411_v49 }
 0x3b9   :  { %435 = vrot.lane.b32.xlu0 %v964_v50, %s1335_s26 }
 0x430   :  { %v413_v51 = vpop.xlane.xlu0 %412 }
 0x431   :  { %v415_v52 = vmul.f32 0.03125, %v413_v51 }
 0x433   :  { %v416_v53 = vsub.f32 %v1509_v47, %v415_v52 }
 0x434   :  { %v436_v13 = vpop.permute.xlu0 %435 }
 0x435   :  { %v417_v54 = vmul.f32 %v416_v53, %v416_v53 }
 0x437   :  { %419 = vrot.lane.b32.xlu1 %v417_v54, %s1336_s0 }
 0x4a9   :  { %v420_v55 = vpop.permute.xlu1 %419 }
 0x4aa   :  { %v422_v56 = vsel %vm217_vm2, %v420_v55, 0.0  ;;  %v977_v55 = vld [vmem:[%s1612_s9 + $0x1] ss:$0 sm:$0xff] }
 0x4ab   :  { %423 = vadd.xlane.f32.xlu1 %v422_v56  ;;  %v813_v56 = vld [vmem:[#allocation11 + $0x40] sm:$0xff] }
 0x4bc   :  { %445 = vrot.lane.b32.xlu1 %v965_v57, %s1335_s26  ;;  %v814_v57 = vld [vmem:[#allocation11 + $0x48] sm:$0xff] }
 0x4bd   :  { %v1127_v59 = vpack.c.bf16 %v814_v57, %v813_v56 }
 0x4bf   :  { %1128 = vmatpush3.bf16.msra.mxu0 %v1127_v59 }
 0x4c0   :  { %1129 = vmatprep.subr.bf16.mxu0 %v1331_v2 }
 0x4c3   :  { %1131 = vmatpush3.bf16.msra.mxu0 %v1130_v1 }
 0x4c6   :  { %1091 = vmatmul.mubr.msk.f32.vlgmr.msra.gmra.mrb[6].mxu0 %vm217_vm2, %v725_v6 }
 0x538   :  { %v424_v9 = vpop.xlane.xlu1 %423 }
 0x539   :  { %v425_v10 = vmul.f32 0.03125, %v424_v9 }
 0x53b   :  { %v426_v11 = vadd.f32 1e-05, %v425_v10 }
 0x53c   :  { %v446_v15 = vpop.permute.xlu1 %445 }
 0x53d   :  { %1153 = vrsqrt.f32 %v426_v11 }
 0x547   :  { %v1154_v12 = vpop.eup %1153 }
 0x548   :  { %v428_v14 = vmul.f32 %v1154_v12, %v416_v53 }
 0x54a   :  { %v438_v16 = vmul.f32 %v436_v13, %v428_v14 }
 0x54c   :  { %v448_v17 = vadd.f32 %v446_v15, %v438_v16 }
 0x54e   :  { %450 = vrot.lane.b32.xlu0 %v448_v17, %s1336_s0 }
 0x552   :  { %642 = vrot.lane.b32.xlu0 %v973_v18, %s1334_s28 }
 0x599   :  { %v886_v16 = vpop.f32.mrb[6].mxu0 }
 0x59a   :  { %v1092_v17 = vpop.f32.mrb[7].mxu0 }
 0x5c0   :  { %v451_v21 = vpop.permute.xlu0 %450 }
 0x5c1   :  { %v1538_v23 = vadd.f32 %v451_v21, %v1496_v22 }
 0x5c3   :  { %1058 = vmatmul.mubr.msk.f32.vlgmr.msra.gmra.mrb[2].mxu1 %vm217_vm2, %v1538_v23 }
 0x5c4   :  { %v643_v24 = vpop.permute.xlu0 %642  ;;  %1079 = vmatprep.mubr.msk.f32.mxu1 %vm1332_vm0, %v1333_v4  ;;  %1122 = vmatpush3.bf16.msra.mxu1 %v1121_v3 }
 0x5c5   :  { %v645_v25 = vadd.f32 %v643_v24, %v624_v19  ;;  %1123 = vmatprep.subr.bf16.mxu1 %v1331_v2  ;;  %v985_v2 = vld [vmem:[%s1610_s7 + $0x2] ss:$0 sm:$0xff]  ;;  %s978_s7 = sld [smem:[#allocation12 + $0x2]] }
 0x5c6   :  { %v980_v24 = vld [vmem:[%s1609_s6 + $0x2] ss:$0 sm:$0xff]  ;;  %s966_s6 = sld [smem:[#allocation12 + $0x1]] }
 0x5c7   :  { %647 = vrot.lane.b32.xlu1 %v645_v25, %s1334_s28 }
 0x5c8   :  { %1125 = vmatpush3.bf16.msra.mxu1 %v1124_v5 }
 0x639   :  { %v648_v34 = vpop.permute.xlu1 %647 }
 0x696   :  { %v546_v27 = vpop.f32.mrb[2].mxu1 }
 0x697   :  { %v547_v28 = vadd.f32 %v968_v26, %v546_v27  ;;  %v1059_v29 = vpop.f32.mrb[3].mxu1 }
 0x699   :  { %v628_v30 = vadd.f32 %v624_v19, %v547_v28 }
 0x69b   :  { %v971_v31 = vmul.f32 -1.442695, %v628_v30 }
 0x69d   :  { %1155 = vpow2.f32 %v971_v31 }
 0x6a7   :  { %v1156_v32 = vpop.eup %1155 }
 0x6a8   :  { %v632_v33 = vadd.f32 1.0, %v1156_v32 }
 0x6aa   :  { %1157 = vrcp.f32 %v632_v33 }
 0x6b4   :  { %v1158_v35 = vpop.eup %1157 }
 0x6b5   :  { %v650_v36 = vmul.f32 %v1158_v35, %v648_v34  ;;  %v657_v40 = vsub.f32 1.0, %v1158_v35  ;;  %v717_v34 = vstv %s978_s7 }
 0x6b7   :  { %652 = vrot.lane.b32.xlu0 %v650_v36, %s1334_s28 }
 0x6bb   :  { %663 = vrot.lane.b32.xlu0 %v463_v8, %s1335_s26 }
 0x729   :  { %v653_v4 = vpop.permute.xlu0 %652 }
 0x72a   :  { %v655_v37 = vadd.f32 %v653_v4, %v547_v28 }
 0x72c   :  { %1159 = vtanh.f32 %v655_v37 }
 0x72d   :  { %v664_v39 = vpop.permute.xlu0 %663 }
 0x72e   :  { %v666_v42 = vmul.f32 %v1158_v35, %v664_v39 }
 0x736   :  { %v1160_v38 = vpop.eup %1159 }
 0x737   :  { %659 = vrot.lane.b32.xlu1 %v1160_v38, %s1336_s0  ;;  %v455_v38 = vstv %s966_s6 }
 0x738   :  { %v456_v39 = vmul.f32 %v455_v38, %v1509_v47 }
 0x7a9   :  { %v660_v41 = vpop.permute.xlu1 %659 }
 0x7aa   :  { %v662_v43 = vmul.f32 %v660_v41, %v657_v40 }
 0x7ac   :  { %v1551_v44 = vadd.f32 %v666_v42, %v662_v43 }
 0x7ae   :  { %669 = vrot.lane.b32.xlu1 %v1551_v44, %s1336_s0  ;;  %v718_v35 = vmul.f32 %v717_v34, %v1551_v44 }
 0x820   :  { %v670_v45 = vpop.permute.xlu1 %669 }
 0x821   :  { %v672_v46 = vsel %vm217_vm2, %v670_v45, 0.0  ;;  %v931_v45 = vstv %s986_s20 }
 0x822   :  { %673 = vadd.xlane.f32.xlu0 %v672_v46 }
 0x838   :  { %696 = vrot.lane.b32.xlu0 %v975_v48, %s1335_s26 }
 0x8af   :  { %v674_v49 = vpop.xlane.xlu0 %673 }
 0x8b0   :  { %v675_v50 = vmul.f32 0.03125, %v674_v49  ;;  %v203_v49 = vstv %s202_s18 }
 0x8b2   :  { %v676_v51 = vsub.f32 %v1551_v44, %v675_v50 }
 0x8b3   :  { %v697_v11 = vpop.permute.xlu0 %696 }
 0x8b4   :  { %v677_v52 = vmul.f32 %v676_v51, %v676_v51 }
 0x8b6   :  { %679 = vrot.lane.b32.xlu1 %v677_v52, %s1336_s0 }
 0x928   :  { %v680_v53 = vpop.permute.xlu1 %679 }
 0x929   :  { %v682_v54 = vsel %vm217_vm2, %v680_v53, 0.0 }
 0x92a   :  { %683 = vadd.xlane.f32.xlu1 %v682_v54 }
 0x93b   :  { %707 = vrot.lane.b32.xlu1 %v977_v55, %s1335_s26 }
 0x9b7   :  { %v684_v7 = vpop.xlane.xlu1 %683 }
 0x9b8   :  { %v685_v8 = vmul.f32 0.03125, %v684_v7 }
 0x9ba   :  { %v686_v9 = vadd.f32 1e-05, %v685_v8 }
 0x9bb   :  { %v708_v13 = vpop.permute.xlu1 %707 }
 0x9bc   :  { %1161 = vrsqrt.f32 %v686_v9 }
 0x9c6   :  { %v1162_v10 = vpop.eup %1161 }
 0x9c7   :  { %v688_v12 = vmul.f32 %v1162_v10, %v676_v51  ;;  %v204_v51 = vmul.f32 %v203_v49, %v1496_v22 }
 0x9c9   :  { %v699_v14 = vmul.f32 %v697_v11, %v688_v12 }
 0x9cb   :  { %v710_v15 = vadd.f32 %v708_v13, %v699_v14 }
 0x9cd   :  { %712 = vrot.lane.b32.xlu0 %v710_v15, %s1336_s0 }
 0x9d1   :  { %904 = vrot.lane.b32.xlu0 %v985_v2, %s1334_s28 }
 0xa3f   :  { %v713_v18 = vpop.permute.xlu0 %712 }
 0xa40   :  { %v715_v19 = vadd.f32 %v713_v18, %v1538_v23 }
 0xa42   :  { %1080 = vmatmul.mubr.msk.f32.vlgmr.msra.gmra.mrb[4].mxu1 %vm217_vm2, %v715_v19 }
 0xa43   :  { %v905_v20 = vpop.permute.xlu0 %904 }
 0xa44   :  { %v907_v21 = vadd.f32 %v905_v20, %v886_v16 }
 0xa46   :  { %909 = vrot.lane.b32.xlu1 %v907_v21, %s1334_s28 }
 0xab8   :  { %v910_v23 = vpop.permute.xlu1 %909 }
 0xb15   :  { %v808_v25 = vpop.f32.mrb[4].mxu1 }
 0xb16   :  { %v809_v26 = vadd.f32 %v980_v24, %v808_v25  ;;  %v1081_v27 = vpop.f32.mrb[5].mxu1 }
 0xb18   :  { %v890_v28 = vadd.f32 %v886_v16, %v809_v26 }
 0xb1a   :  { %v983_v29 = vmul.f32 -1.442695, %v890_v28 }
 0xb1c   :  { %1163 = vpow2.f32 %v983_v29 }
 0xb26   :  { %v1164_v30 = vpop.eup %1163 }
 0xb27   :  { %v894_v31 = vadd.f32 1.0, %v1164_v30 }
 0xb29   :  { %1165 = vrcp.f32 %v894_v31 }
 0xb33   :  { %v1166_v32 = vpop.eup %1165 }
 0xb34   :  { %v912_v33 = vmul.f32 %v1166_v32, %v910_v23  ;;  %v919_v41 = vsub.f32 1.0, %v1166_v32 }
 0xb36   :  { %914 = vrot.lane.b32.xlu0 %v912_v33, %s1334_s28 }
 0xb3a   :  { %925 = vrot.lane.b32.xlu0 %v725_v6, %s1335_s26 }
 0xb3e   :  { %720 = vrot.lane.b32.xlu0 %v718_v35, %s1336_s0 }
 0xba8   :  { %v915_v36 = vpop.permute.xlu0 %914 }
 0xba9   :  { %v917_v4 = vadd.f32 %v915_v36, %v809_v26 }
 0xbab   :  { %1167 = vtanh.f32 %v917_v4 }
 0xbac   :  { %v926_v40 = vpop.permute.xlu0 %925 }
 0xbad   :  { %v928_v43 = vmul.f32 %v1166_v32, %v926_v40 }
 0xbb0   :  { %v721_v47 = vpop.permute.xlu0 %720 }
 0xbb5   :  { %v1168_v37 = vpop.eup %1167 }
 0xbb6   :  { %921 = vrot.lane.b32.xlu1 %v1168_v37, %s1336_s0 }
 0xbba   :  { %458 = vrot.lane.b32.xlu1 %v456_v39, %s1336_s0 }
 0xc28   :  { %v922_v42 = vpop.permute.xlu1 %921 }
 0xc29   :  { %v924_v44 = vmul.f32 %v922_v42, %v919_v41 }
 0xc2b   :  { %v929_v46 = vadd.f32 %v928_v43, %v924_v44 }
 0xc2c   :  { %v459_v50 = vpop.permute.xlu1 %458 }
 0xc2d   :  { %v932_v48 = vmul.f32 %v931_v45, %v929_v46  ;;  %v461_v52 = vadd.f32 %v459_v50, %v204_v51 }
 0xc2f   :  { %934 = vrot.lane.b32.xlu1 %v932_v48, %s1336_s0  ;;  %v723_v53 = vadd.f32 %v721_v47, %v461_v52 }
 0xca1   :  { %v935_v54 = vpop.permute.xlu1 %934 }
 0xca2   :  { %v937_v55 = vadd.f32 %v935_v54, %v723_v53 }
 0xca4   :  { %938 = vst.msk [vmem:[#allocation13] sm:$0xff] %vm217_vm2, %v937_v55 }
 0xca5   :  { %1302 = shalt.err (!%p1299_p7)
}
 0xca6   :  { %s1303_s25 = scalar_lea.hbm %s1614_s11, 128 }
 0xca7   :  { %p1304_p8 = scmp.ne.s32.totalorder %s1614_s11, %s1303_s25  ;;  %p1307_p9 = scmp.lt.u32.totalorder %s1303_s25, %s1614_s11 }
 0xca9   :  { %p1309_p10 = pnand %p1307_p9, %p1304_p8 }
 0xcab   :  { %1312 = shalt.err (!%p1309_p10)
}
 0xcac   :  { %948 = dma.vmem_to_hbm [thread:$0]  %s946_s5, 128, %s1614_s11, [#allocation4]  }
 0xcad   :  { %1321 = dma.done.wait [#allocation4], 128  }
 0xcae   :  { %1322 = vsyncadd [#allocation4], 4294967168 }
 0xcaf   :  { %952 = vsyncpa [#allocation3], 1 }
 0xcb0   :  { %953 = vsyncpa [#allocation7], 1 }
 0xcb1   :  { %954 = vsyncpa [#allocation10], 1 }
 0xcb2   :  { %955 = vsyncpa [#allocation4], 1 }
 0xcb3   :  { %956 = vsyncpa [#allocation5], 1 }

</bundles_post_ra>
